<compile_context>
chip_gen: v6e
topology: v6e:2x2x1
jax: 0.10.0
libtpu: 0.0.40
codegen_flags: <defaults>
</compile_context>

<pallas_src>
import jax
import jax.numpy as jnp
from jax.experimental import pallas as pl
from jax.experimental.pallas import tpu as pltpu


# ----------------------------- small helpers --------------------------------

def _round_up(x: int, m: int) -> int:
    return (x + m - 1) // m * m


def _round_down(x: int, m: int) -> int:
    return (x // m) * m


def _sublane_multiple(dtype) -> int:
    """Minimum sublane packing for a dtype (rows of a vreg tile)."""
    itemsize = jnp.dtype(dtype).itemsize
    if itemsize >= 4:
        return 8
    if itemsize == 2:
        return 16
    return 32


def _vmem_capacity_bytes() -> int:
    try:
        return int(pltpu.get_tpu_info().vmem_capacity_bytes)
    except Exception:
        return 64 * 1024 * 1024  # conservative fallback (v7x per-core size)


def _div_tile(c_pad: int, target: int) -> int:
    """Largest multiple of 128 that divides c_pad and is <= target."""
    best = 128
    d = 128
    limit = min(target, c_pad)
    while d <= limit:
        if c_pad % d == 0:
            best = d
        d += 128
    return best


# ------------------------------- kernels -------------------------------------

def _ridge_kernel_bias(x_ref, w_ref, b_ref, o_ref):
    # x_ref: (TM, F), w_ref: (F, TN), b_ref: (1, TN), o_ref: (TM, TN)
    acc = jnp.dot(x_ref[...], w_ref[...], preferred_element_type=jnp.float32)
    o_ref[...] = (acc + b_ref[...]).astype(o_ref.dtype)


def _ridge_kernel_nobias(x_ref, w_ref, o_ref):
    acc = jnp.dot(x_ref[...], w_ref[...], preferred_element_type=jnp.float32)
    o_ref[...] = acc.astype(o_ref.dtype)


# ------------------------------- wrapper --------------------------------------

def ridge_forward(x, weight, *, bias: bool, tile_m: int | None = None,
                  tile_n: int | None = None):
    """Pallas implementation of Ridge.forward (fast path, precomputed weight).

    x:      (n_samples, in_features) or (n_samples, effective_in_features)
    weight: (effective_in_features, out_features)
    """
    n, fx = x.shape
    eff_in, c = weight.shape

    # Mirror potentially_add_bias: fold the ones column iff x lacks it.
    if bias:
        if fx == eff_in - 1:
            fold_bias = True
        elif fx == eff_in:
            fold_bias = False  # x already carries the ones column
        else:
            raise ValueError(
                f"x feature dim {fx} incompatible with weight rows {eff_in} (bias=True)")
    else:
        if fx != eff_in:
            raise ValueError(
                f"x feature dim {fx} incompatible with weight rows {eff_in} (bias=False)")
        fold_bias = False
    f = fx

    if fold_bias:
        w_lin = weight[:f, :].astype(x.dtype)          # (F, C) linear part
        w_bias = weight[f:f + 1, :].astype(x.dtype)    # (1, C) bias row
    else:
        w_lin = weight.astype(x.dtype)
        w_bias = None

    # Lane-dense output: pad out_features to a multiple of 128 (zero columns).
    c_pad = _round_up(max(c, 1), 128)
    if c_pad != c:
        w_lin = jnp.pad(w_lin, ((0, 0), (0, c_pad - c)))
        if w_bias is not None:
            w_bias = jnp.pad(w_bias, ((0, 0), (0, c_pad - c)))

    # ---------------- VMEM-accurate, generation-aware tile sizing -------------
    itemsize = jnp.dtype(x.dtype).itemsize
    s = _sublane_multiple(x.dtype)          # sublane packing (8/16/32)
    f_lanes = _round_up(f, 128)             # lane footprint of an x row in VMEM
    f_rows = _round_up(f, s)                # sublane footprint of the weight block

    vmem_cap = _vmem_capacity_bytes()
    # ~32 MiB of kernel buffers on 128 MiB parts (v5e/v6e), ~16 MiB on v7x.
    budget = min(vmem_cap // 4, 32 * 1024 * 1024)

    # tile_n: width of the (single-buffered when constant) resident weight slab.
    if tile_n is None:
        tile_n = c_pad
        w_budget = budget // 2
        if f_rows * c_pad * itemsize > w_budget and c_pad > 128:
            per_col = f_rows * itemsize
            target = max(128, _round_down(w_budget // per_col, 128))
            tile_n = _div_tile(c_pad, target)
    tile_n = _div_tile(c_pad, min(_round_up(tile_n, 128), c_pad))
    # TODO(synk): if even a (f, 128) weight slab exceeds the VMEM budget (huge
    # effective_in_features), add a K-tiled accumulator fallback; unnecessary
    # for Ridge-sized feature dims.

    # tile_m: biggest row tile whose double-buffered x + out tiles fit the rest.
    w_bytes_1 = f_rows * tile_n * itemsize
    b_bytes_1 = (s * tile_n * itemsize) if fold_bias else 0
    if tile_m is None:
        rem = max(budget - w_bytes_1 - b_bytes_1, 2 * 1024 * 1024)
        per_row = 2 * (f_lanes + tile_n) * itemsize     # x + out, double-buffered
        tile_m = _round_down(rem // per_row, s)
        tile_m = max(s, min(tile_m, 1024))
    tile_m = max(s, _round_up(tile_m, s))
    tile_m = min(tile_m, _round_up(n, s))

    grid_m = pl.cdiv(n, tile_m)
    grid_n = pl.cdiv(c_pad, tile_n)

    # Megacore (v7x has 2 TCs): expose >= 2 'parallel' grid steps for problems
    # big enough that the ~0.35us/step overhead is negligible.
    if grid_m * grid_n == 1 and n * c_pad >= 256 * 256:
        if c_pad >= 256:
            tile_n = _div_tile(c_pad, c_pad // 2)
            grid_n = pl.cdiv(c_pad, tile_n)
        elif n > s:
            tile_m = max(s, _round_up(pl.cdiv(n, 2), s))
            grid_m = pl.cdiv(n, tile_m)

    # ---------------- VMEM limit from actual buffer sizes ---------------------
    w_buf_count = 1 if grid_n == 1 else 2
    x_tile_bytes = 2 * tile_m * f_lanes * itemsize
    o_tile_bytes = 2 * tile_m * tile_n * itemsize
    w_tile_bytes = w_buf_count * f_rows * tile_n * itemsize
    b_tile_bytes = (w_buf_count * s * tile_n * itemsize) if fold_bias else 0
    total_bytes = x_tile_bytes + o_tile_bytes + w_tile_bytes + b_tile_bytes
    vmem_limit = int(min(max(vmem_cap - (8 << 20), 16 << 20),
                         max(2 * total_bytes + (4 << 20), 32 << 20)))

    cost = pl.CostEstimate(
        flops=2 * n * f * c_pad,
        transcendentals=0,
        bytes_accessed=itemsize * (n * f + grid_m * f * c_pad + n * c_pad),
    )

    # ------------------------------- specs ------------------------------------
    x_spec = pl.BlockSpec((tile_m, f), lambda i, j: (i, 0))
    o_spec = pl.BlockSpec((tile_m, tile_n), lambda i, j: (i, j))
    if grid_n == 1:
        # Constant index across the grid -> single-buffer the resident weight.
        w_spec = pl.BlockSpec((f, tile_n), lambda i, j: (0, j),
                              pipeline_mode=pl.Buffered(1))
        b_spec = pl.BlockSpec((1, tile_n), lambda i, j: (0, j),
                              pipeline_mode=pl.Buffered(1))
    else:
        w_spec = pl.BlockSpec((f, tile_n), lambda i, j: (0, j))
        b_spec = pl.BlockSpec((1, tile_n), lambda i, j: (0, j))

    if fold_bias:
        kernel = _ridge_kernel_bias
        in_specs = [x_spec, w_spec, b_spec]
        operands = (x, w_lin, w_bias)
    else:
        kernel = _ridge_kernel_nobias
        in_specs = [x_spec, w_spec]
        operands = (x, w_lin)

    out = pl.pallas_call(
        kernel,
        out_shape=jax.ShapeDtypeStruct((n, c_pad), x.dtype),
        grid_spec=pltpu.PrefetchScalarGridSpec(
            num_scalar_prefetch=0,
            grid=(grid_m, grid_n),
            in_specs=in_specs,
            out_specs=o_spec,
        ),
        compiler_params=pltpu.CompilerParams(
            dimension_semantics=("parallel", "parallel"),
            vmem_limit_bytes=vmem_limit,
        ),
        cost_estimate=cost,
    )(*operands)

    # Skip the column slice when out_features is already lane-aligned.
    if c_pad == c:
        return out
    return out[:, :c]


def calculate_ridge_weights(G, c, ridge):
    """Closed-form ridge solve (plain-JAX glue, mirrors the PyTorch helper)."""
    return jnp.linalg.solve(G + ridge * jnp.eye(G.shape[0], dtype=G.dtype), c)


# --------------------------------- test ---------------------------------------

if __name__ == "__main__":
    key = jax.random.PRNGKey(0)

    # Small shapes consistent with the module: Ridge(in_features=32, out_features=16, bias=True)
    in_features = 32
    out_features = 16
    bias = True

    n_fit = 64     # synthetic samples used to build G, c (module's `update` path)
    n_eval = 16    # samples for forward pass

    k1, k2, k3 = jax.random.split(key, 3)

    # Deterministically synthesize the buffers G, c and solve for `weight`
    # (this is the module's precomputed fast-inference weight).
    fit_feats = jax.random.normal(k1, (n_fit, in_features), dtype=jnp.float32)
    ones = jnp.ones((n_fit, 1), dtype=jnp.float32)
    fit_feats_b = jnp.concatenate([fit_feats, ones], axis=1)          # potentially_add_bias
    labels = jax.random.randint(k2, (n_fit,), 0, out_features)
    onehot = jax.nn.one_hot(labels, out_features, dtype=jnp.float32)  # target2onehot

    G = fit_feats_b.T @ fit_feats_b                                   # (eff_in, eff_in)
    c = fit_feats_b.T @ onehot                                        # (eff_in, out_features)
    ridge = 1e-2
    weight = calculate_ridge_weights(G, c, ridge)                     # (eff_in, out_features)

    # Forward input (n_samples, in_features); the kernel folds in the bias column.
    x = jax.random.normal(k3, (n_eval, in_features), dtype=jnp.float32)

    out = ridge_forward(x, weight, bias=bias)
    out = jax.block_until_ready(out)

    # Reference: torch forward == cat([x, ones], 1) @ weight
    x_b = jnp.concatenate([x, jnp.ones((n_eval, 1), jnp.float32)], axis=1)
    ref = x_b @ weight
    assert out.shape == (n_eval, out_features)
    assert jnp.allclose(out, ref, atol=1e-4, rtol=1e-4), "mismatch vs reference"

    # Also exercise a ragged-row / multi-tile path (no wrapper-side padding of x).
    x2 = jax.random.normal(k3, (1000, in_features), dtype=jnp.float32)
    out2 = jax.block_until_ready(ridge_forward(x2, weight, bias=bias, tile_m=256))
    ref2 = jnp.concatenate([x2, jnp.ones((1000, 1), jnp.float32)], axis=1) @ weight
    assert out2.shape == (1000, out_features)
    assert jnp.allclose(out2, ref2, atol=1e-4, rtol=1e-4), "mismatch vs reference (ragged)"

    print("KERNEL_OK")
</pallas_src>

<mosaic_0001>
module attributes {stable_mosaic.version = 11 : i64} {
  func.func @_ridge_kernel_bias(%arg0: i32, %arg1: i32, %arg2: memref<16x32xf32, #tpu.memory_space<vmem>>, %arg3: memref<32x128xf32, #tpu.memory_space<vmem>>, %arg4: memref<1x128xf32, #tpu.memory_space<vmem>>, %arg5: memref<16x128xf32, #tpu.memory_space<vmem>>) attributes {dimension_semantics = [#tpu.dimension_semantics<parallel>, #tpu.dimension_semantics<parallel>], iteration_bounds = array<i64: 1, 1>, scalar_prefetch = 0 : i64, scratch_operands = 0 : i64, tpu.core_type = #tpu.core_type<tc>, window_params = [{transform_indices = @transform_0, window_bounds = array<i64: 16, 32>}, {pipeline_mode = #tpu.pipeline_mode<synchronous>, transform_indices = @transform_1, window_bounds = array<i64: 32, 128>}, {pipeline_mode = #tpu.pipeline_mode<synchronous>, transform_indices = @transform_2, window_bounds = array<i64: 1, 128>}, {transform_indices = @transform_3, window_bounds = array<i64: 16, 128>}]} {
    %c0 = arith.constant 0 : index
    %c0_0 = arith.constant 0 : index
    %0 = vector.load %arg2[%c0, %c0_0] : memref<16x32xf32, #tpu.memory_space<vmem>>, vector<16x32xf32>
    %c0_1 = arith.constant 0 : index
    %c0_2 = arith.constant 0 : index
    %1 = vector.load %arg3[%c0_1, %c0_2] : memref<32x128xf32, #tpu.memory_space<vmem>>, vector<32x128xf32>
    %cst = arith.constant dense<0.000000e+00> : vector<16x128xf32>
    %2 = tpu.matmul %0, %1, %cst {dimension_numbers = #tpu.dot_dimension_numbers<[1], [0], [0], [1], [0, 0, 1, 1], [], []>} : vector<16x32xf32>, vector<32x128xf32>, vector<16x128xf32> -> vector<16x128xf32>
    %c0_3 = arith.constant 0 : index
    %c0_4 = arith.constant 0 : index
    %3 = vector.load %arg4[%c0_3, %c0_4] : memref<1x128xf32, #tpu.memory_space<vmem>>, vector<1x128xf32>
    %4 = vector.broadcast %3 : vector<1x128xf32> to vector<16x128xf32>
    %5 = arith.addf %2, %4 : vector<16x128xf32>
    %c0_5 = arith.constant 0 : index
    %c0_6 = arith.constant 0 : index
    %6 = vector.load %arg5[%c0_5, %c0_6] : memref<16x128xf32, #tpu.memory_space<vmem>>, vector<16x128xf32>
    tpu.vector_store %arg5[%c0_5, %c0_6], %5 {strides = array<i32>} : memref<16x128xf32, #tpu.memory_space<vmem>>, vector<16x128xf32>,
    return
  }
  func.func @transform_0(%arg0: i32, %arg1: i32) -> (i32, i32) {
    %c0_i32 = arith.constant 0 : i32
    %c0_i32_0 = arith.constant 0 : i32
    return %arg0, %c0_i32 : i32, i32
  }
  func.func @transform_1(%arg0: i32, %arg1: i32) -> (i32, i32) {
    %c0_i32 = arith.constant 0 : i32
    %c0_i32_0 = arith.constant 0 : i32
    return %c0_i32, %arg1 : i32, i32
  }
  func.func @transform_2(%arg0: i32, %arg1: i32) -> (i32, i32) {
    %c0_i32 = arith.constant 0 : i32
    %c0_i32_0 = arith.constant 0 : i32
    return %c0_i32, %arg1 : i32, i32
  }
  func.func @transform_3(%arg0: i32, %arg1: i32) -> (i32, i32) {
    %c0_i32 = arith.constant 0 : i32
    return %arg0, %arg1 : i32, i32
  }
}

</mosaic_0001>

<bundles_post_ra>
// kernel: tpu_custom_call.1
= control target key start
LH: loop header
LB: loop body
LE: loop exit
PB: predicated region body
PF: predicated region fallthrough
CT: control target
= control target key end

     0   :  { %8 = vsyncpa [#allocation3], 0  ;;  %s297_s0 = inlined_call_operand.hbm [shape: f32[16,32], index: 0, kind: input, shape index: {}]   ;;  %s298_s1 = inlined_call_operand.hbm [shape: f32[32,128], index: 1, kind: input, shape index: {}]   ;;  %s299_s2 = inlined_call_operand.vmem [shape: f32[1,128], index: 2, kind: input, shape index: {}]   ;;  %s300_s3 = inlined_call_operand.hbm [shape: f32[16,128], index: 3, kind: output, shape index: {}]  }
   0x1   :  { %9 = vsyncpa [#allocation6], 0 }
   0x2   :  { %10 = vsyncpa [#allocation4], 0  ;;  %s249_s12 = smov [#allocation2]  }
   0x3   :  { %s16_s13 = sshll.u32 %s249_s12, 4  ;;  %s17_s13 = int_to_ptr.vmem [resolvable:$true] %s16_s13 }
   0x4   :  { %s191_s14 = scalar_lea.vmem %s17_s13, 256  ;;  %p196_p1 = scmp.lt.s32.totalorder %s17_s13, %s17_s13 }
   0x5   :  { %p192_p0 = scmp.ne.s32.totalorder %s17_s13, %s191_s14  ;;  %p197_p2 = scmp.lt.s32.totalorder %s191_s14, %s191_s14 }
   0x7   :  { %p198_p3 = por %p197_p2, %p196_p1 }
   0x9   :  { %p199_p4 = pnand %p198_p3, %p192_p0 }
   0xb   :  { %202 = shalt.err (!%p199_p4)
}
   0xc   :  { %s250_s15 = smov 128   ;;  %s251_s16 = smov 8  }
   0xd   :  { %22 = dma.hbm_to_vmem [thread:$0]  %s297_s0, 256, %s17_s13, [#allocation3], %s250_s15, %s250_s15, %s251_s16  }
   0xe   :  { %s252_s19 = smov [#allocation5]  }
   0xf   :  { %s28_s20 = sshll.u32 %s252_s19, 4  ;;  %s29_s20 = int_to_ptr.vmem [resolvable:$true] %s28_s20 }
  0x10   :  { %s211_s21 = scalar_lea.vmem %s29_s20, 512  ;;  %p216_p6 = scmp.lt.s32.totalorder %s29_s20, %s29_s20 }
  0x11   :  { %p212_p5 = scmp.ne.s32.totalorder %s29_s20, %s211_s21  ;;  %p217_p7 = scmp.lt.s32.totalorder %s211_s21, %s211_s21 }
  0x13   :  { %p218_p8 = por %p217_p7, %p216_p6 }
  0x15   :  { %p219_p9 = pnand %p218_p8, %p212_p5 }
  0x17   :  { %222 = shalt.err (!%p219_p9)
}
  0x18   :  { %34 = dma.hbm_to_vmem [thread:$0]  %s298_s1, 512, %s29_s20, [#allocation6], %s250_s15, %s250_s15, %s251_s16  }
  0x19   :  { %243 = dma.done.wait [#allocation3], 256  }
  0x1a   :  { %244 = vsyncadd [#allocation3], 4294967040 }
  0x1b   :  { %245 = dma.done.wait [#allocation6], 512  }
  0x1c   :  { %246 = vsyncadd [#allocation6], 4294966784  ;;  %vm56_vm0 = vcmask 261120   ;;  %v48_v0 = vld [vmem:[#allocation5 + $0x18] sm:$0xff]  ;;  %v47_v1 = vld [vmem:[#allocation5 + $0x10] sm:$0xff]  ;;  %s253_s24 = smov [#allocation7]  }
  0x1d   :  { %167 = vmatprep.subr.mxu0 %v48_v0  ;;  %v43_v2 = vld [vmem:[#allocation2] sm:$0xff]  ;;  %v46_v3 = vld [vmem:[#allocation5 + $0x8] sm:$0xff]  ;;  %v45_v4 = vld [vmem:[#allocation5] sm:$0xff]  ;;  %s145_s25 = sshll.u32 %s253_s24, 4  ;;  %s146_s25 = int_to_ptr.vmem [resolvable:$true] %s145_s25 }
  0x1e   :  { %168 = vmatpush3.msra.mxu0 %v48_v0  ;;  %175 = vmatprep.mubr.msk.f32.mxu0 %vm56_vm0, %v43_v2  ;;  %v44_v5 = vld [vmem:[#allocation2 + $0x8] sm:$0xff]  ;;  %v158_v6 = vld [vmem:[%s299_s2] ss:$0 sm:$0xff]  ;;  %s223_s26 = scalar_lea.vmem %s146_s25, 256  ;;  %p228_p11 = scmp.lt.s32.totalorder %s146_s25, %s146_s25 }
  0x1f   :  { %169 = vmatprep.subr.mxu0 %v47_v1  ;;  %p224_p10 = scmp.ne.s32.totalorder %s146_s25, %s223_s26  ;;  %p229_p12 = scmp.lt.s32.totalorder %s223_s26, %s223_s26 }
  0x20   :  { %170 = vmatpush3.msra.mxu0 %v47_v1 }
  0x21   :  { %171 = vmatprep.subr.mxu0 %v46_v3  ;;  %p230_p13 = por %p229_p12, %p228_p11 }
  0x22   :  { %172 = vmatpush3.msra.mxu0 %v46_v3 }
  0x23   :  { %173 = vmatprep.subr.mxu0 %v45_v4  ;;  %p231_p0 = pnand %p230_p13, %p224_p10 }
  0x24   :  { %174 = vmatpush3.msra.mxu0 %v45_v4 }
  0x25   :  { %176 = vmatmul.mubr.msk.f32.vlgmr.msra.gmra.mxu0 %vm56_vm0, %v44_v5 }
  0xe5   :  { %v177_v7 = vpop.f32.mrf.mxu0 }
  0xe6   :  { %v135_v8 = vadd.f32 %v177_v7, %v158_v6 }
  0xe7   :  { %v129_v9 = vpop.f32.mrf.mxu0 }
  0xe8   :  { %139 = vst [vmem:[#allocation7 + $0x8] sm:$0xff] %v135_v8  ;;  %v130_v10 = vadd.f32 %v158_v6, %v129_v9 }
  0xea   :  { %138 = vst [vmem:[#allocation7] sm:$0xff] %v130_v10 }
  0xeb   :  { %234 = shalt.err (!%p231_p0)
}
  0xec   :  { %151 = dma.vmem_to_hbm [thread:$0]  %s146_s25, 256, %s300_s3, [#allocation4], %s250_s15, %s250_s15, %s251_s16  }
  0xed   :  { %247 = dma.done.wait [#allocation4], 256  }
  0xee   :  { %248 = vsyncadd [#allocation4], 4294967040 }
  0xef   :  { %155 = vsyncpa [#allocation3], 1 }
  0xf0   :  { %156 = vsyncpa [#allocation6], 1 }
  0xf1   :  { %157 = vsyncpa [#allocation4], 1 }

</bundles_post_ra>
